<compile_context>
chip_gen: v5e
topology: v5e:2x2
jax: 0.10.0
libtpu: 0.0.40
codegen_flags: <defaults>
</compile_context>

<pallas_src>
import jax
import jax.numpy as jnp
from jax.experimental import pallas as pl
from jax.experimental.pallas import tpu as pltpu


# ----------------------------------------------------------------------------
# Pallas kernel
# ----------------------------------------------------------------------------
def gcn2_kernel(a_ref,        # [TILE_M, N]  bf16   row slab of A_hat
                x_ref,        # [N, fea]     f32    resident
                pa_ref,       # [G, TILE_M]  f32    column slab of P @ A_hat
                w1_ref, b1_ref,
                w2_ref, b2_ref,
                wf1_ref, bf1_ref,
                wf2_ref, bf2_ref,   # BN already folded into these
                out_ref,      # [G, cla]     f32    resident (written on last step)
                xw1_scratch,  # [N, 32]      bf16   resident scratch
                pooled_acc):  # [G, 64]      f32    accumulator scratch
    f32 = jnp.float32
    i = pl.program_id(0)

    # --- one-time init: X @ W1 (kept in bf16 to feed the bf16 A-matmul) ------
    @pl.when(i == 0)
    def _init():
        xw1 = jnp.dot(x_ref[...], w1_ref[...], preferred_element_type=f32)
        xw1_scratch[...] = xw1.astype(xw1_scratch.dtype)
        pooled_acc[...] = jnp.zeros_like(pooled_acc)

    # --- GCNConv1 on this row slab: h1 = A_tile @ (X W1) + b1 ----------------
    h1 = jnp.dot(a_ref[...], xw1_scratch[...],
                 preferred_element_type=f32) + b1_ref[...]          # [TILE_M, 32]

    # --- GCNConv2 + scatter_mean folded: pooled += PA_tile @ (h1 @ W2) -------
    hw2 = jnp.dot(h1, w2_ref[...], preferred_element_type=f32)      # [TILE_M, 64]
    pooled_acc[...] += jnp.dot(pa_ref[...], hw2,
                               preferred_element_type=f32)          # [G, 64]

    # --- FC head on the last step --------------------------------------------
    @pl.when(i == pl.num_programs(0) - 1)
    def _finalize():
        pooled = pooled_acc[...] + b2_ref[...]                       # [G, 64]
        z = jnp.dot(pooled, wf1_ref[...], preferred_element_type=f32) + bf1_ref[...]
        z = jnp.maximum(z, 0.0)
        # BatchNorm1d(eval) folded into wf2/bf2; Dropout(eval) == identity.
        logits = jnp.dot(z, wf2_ref[...], preferred_element_type=f32) + bf2_ref[...]
        out_ref[...] = jax.nn.sigmoid(logits)


# ----------------------------------------------------------------------------
# Wrapper
# ----------------------------------------------------------------------------
def gcn2_forward(a_hat, x, pool_mat, kernel_params, *, tile_m=128):
    """Fused GCN2 forward. kernel_params = (w1,b1,w2,b2,wf1,bf1,wf2_fold,bf2_fold)."""
    (w1, b1, w2, b2, wf1, bf1, wf2f, bf2f) = kernel_params
    N, _fea = x.shape
    G = pool_mat.shape[0]
    cla = wf2f.shape[1]
    assert N % tile_m == 0 and tile_m % 16 == 0, "tile_m must tile N, multiple of 16"

    # bf16 adjacency (dominant operand), pooling folded into conv2.
    a_bf16 = a_hat.astype(jnp.bfloat16)
    pa = jnp.dot(pool_mat, a_hat)                     # [G, N] f32

    grid = (N // tile_m,)

    def resident(shape):
        return pl.BlockSpec(shape, lambda i, _s=shape: tuple(0 for _ in _s))

    in_specs = [
        pl.BlockSpec((tile_m, N), lambda i: (i, 0)),   # A_hat row slab (bf16)
        resident(x.shape),                             # X (full, resident)
        pl.BlockSpec((G, tile_m), lambda i: (0, i)),   # PA column slab
        resident(w1.shape), resident(b1.shape),
        resident(w2.shape), resident(b2.shape),
        resident(wf1.shape), resident(bf1.shape),
        resident(wf2f.shape), resident(bf2f.shape),
    ]

    return pl.pallas_call(
        gcn2_kernel,
        out_shape=jax.ShapeDtypeStruct((G, cla), jnp.float32),
        grid_spec=pltpu.PrefetchScalarGridSpec(
            num_scalar_prefetch=0,
            grid=grid,
            in_specs=in_specs,
            out_specs=resident((G, cla)),
            scratch_shapes=[pltpu.VMEM((N, 32), jnp.bfloat16),   # X @ W1
                            pltpu.VMEM((G, 64), jnp.float32)],   # pooled acc
        ),
        compiler_params=pltpu.CompilerParams(
            # row-tile axis is a reduction into pooled_acc -> "arbitrary"
            dimension_semantics=("arbitrary",),
            # sized generously for (2 x bf16 A slab + PA slab + weights + scratch)
            vmem_limit_bytes=48 * 1024 * 1024,
        ),
    )(a_bf16, x, pa, w1, b1, w2, b2, wf1, bf1, wf2f, bf2f)


# ----------------------------------------------------------------------------
# Plain-JAX glue
# ----------------------------------------------------------------------------
def build_normalized_adjacency(edge_index, num_nodes):
    """A_hat = D^{-1/2} (A + I) D^{-1/2}; A[i, j] counts edges j->i (PyG gcn_norm)."""
    src, dst = edge_index[0], edge_index[1]
    A = jnp.zeros((num_nodes, num_nodes), jnp.float32)
    A = A.at[dst, src].add(1.0)
    A = A + jnp.eye(num_nodes, dtype=jnp.float32)
    deg = jnp.sum(A, axis=1)
    dinv = jnp.where(deg > 0, 1.0 / jnp.sqrt(deg), 0.0)
    return dinv[:, None] * A * dinv[None, :]


def build_pool_matrix(batch, num_graphs):
    """P[g, n] = (batch[n]==g)/count[g]  ->  P @ H == scatter_mean(H, batch)."""
    onehot = (batch[None, :] == jnp.arange(num_graphs)[:, None]).astype(jnp.float32)
    counts = jnp.maximum(jnp.sum(onehot, axis=1, keepdims=True), 1.0)
    return onehot / counts


def init_raw_params(key, fea, cla):
    ks = jax.random.split(key, 12)
    s = 0.1
    w1 = s * jax.random.normal(ks[0], (fea, 32), jnp.float32)
    b1 = s * jax.random.normal(ks[1], (1, 32), jnp.float32)
    w2 = s * jax.random.normal(ks[2], (32, 64), jnp.float32)
    b2 = s * jax.random.normal(ks[3], (1, 64), jnp.float32)
    wf1 = s * jax.random.normal(ks[4], (64, 32), jnp.float32)
    bf1 = s * jax.random.normal(ks[5], (1, 32), jnp.float32)
    wf2 = s * jax.random.normal(ks[6], (32, cla), jnp.float32)
    bf2 = s * jax.random.normal(ks[7], (1, cla), jnp.float32)
    # BatchNorm1d(32) eval-mode stats/affine (non-trivial, to exercise the fold)
    gamma = 1.0 + 0.1 * jax.random.normal(ks[8], (1, 32), jnp.float32)
    beta = 0.1 * jax.random.normal(ks[9], (1, 32), jnp.float32)
    rmean = 0.1 * jax.random.normal(ks[10], (1, 32), jnp.float32)
    rvar = 1.0 + jnp.abs(0.1 * jax.random.normal(ks[11], (1, 32), jnp.float32))
    eps = 1e-5
    return (w1, b1, w2, b2, wf1, bf1, gamma, beta, rmean, rvar, eps, wf2, bf2)


def fold_params_for_kernel(raw):
    """Fold eval-mode BatchNorm1d into the final Linear layer."""
    (w1, b1, w2, b2, wf1, bf1, gamma, beta, rmean, rvar, eps, wf2, bf2) = raw
    scale = gamma / jnp.sqrt(rvar + eps)            # (1, 32)
    shift = beta - rmean * scale                    # (1, 32)
    wf2_fold = scale.T * wf2                        # (32, cla)
    bf2_fold = shift @ wf2 + bf2                    # (1, cla)
    return (w1, b1, w2, b2, wf1, bf1, wf2_fold, bf2_fold)


def gcn2_reference(a_hat, x, pool_mat, raw):
    """Pure-JAX f32 reference of the PyTorch forward (eval mode, activation==2)."""
    (w1, b1, w2, b2, wf1, bf1, gamma, beta, rmean, rvar, eps, wf2, bf2) = raw
    h1 = a_hat @ (x @ w1) + b1
    h2 = a_hat @ (h1 @ w2) + b2
    pooled = pool_mat @ h2
    z = jnp.maximum(pooled @ wf1 + bf1, 0.0)
    z = (z - rmean) / jnp.sqrt(rvar + eps) * gamma + beta
    return jax.nn.sigmoid(z @ wf2 + bf2)


# ----------------------------------------------------------------------------
if __name__ == "__main__":
    key = jax.random.PRNGKey(0)
    k_x, k_src, k_dst, k_par = jax.random.split(key, 4)

    # Small problem: 2 graphs x 128 nodes, fea=8 node features, cla=4 classes.
    num_nodes = 256
    num_graphs = 2
    fea = 8
    cla = 4
    num_edges = 512
    tile_m = 128                      # 2 grid steps over the node-row axis

    x = jax.random.normal(k_x, (num_nodes, fea), jnp.float32)            # data.x
    src = jax.random.randint(k_src, (num_edges,), 0, num_nodes)
    dst = jax.random.randint(k_dst, (num_edges,), 0, num_nodes)
    edge_index = jnp.stack([src, dst])                                   # data.edge_index
    batch = jnp.concatenate([jnp.zeros(128, jnp.int32),
                             jnp.ones(128, jnp.int32)])                  # data.batch

    a_hat = build_normalized_adjacency(edge_index, num_nodes)
    pool_mat = build_pool_matrix(batch, num_graphs)
    raw_params = init_raw_params(k_par, fea, cla)
    kernel_params = fold_params_for_kernel(raw_params)

    out = gcn2_forward(a_hat, x, pool_mat, kernel_params, tile_m=tile_m)
    out = jax.block_until_ready(out)

    assert out.shape == (num_graphs, cla)
    assert bool(jnp.all(jnp.isfinite(out)))

    # Loose tolerance: kernel stores A_hat / X@W1 in bf16 (f32 accumulation).
    ref = gcn2_reference(a_hat, x, pool_mat, raw_params)
    assert bool(jnp.allclose(out, ref, atol=5e-2, rtol=5e-2))

    print("KERNEL_OK")
</pallas_src>

<mosaic_0001>
module attributes {stable_mosaic.version = 11 : i64} {
  func.func @gcn2_kernel(%arg0: i32, %arg1: memref<128x256xbf16, #tpu.memory_space<vmem>>, %arg2: memref<256x8xf32, #tpu.memory_space<vmem>>, %arg3: memref<2x128xf32, #tpu.memory_space<vmem>>, %arg4: memref<8x32xf32, #tpu.memory_space<vmem>>, %arg5: memref<1x32xf32, #tpu.memory_space<vmem>>, %arg6: memref<32x64xf32, #tpu.memory_space<vmem>>, %arg7: memref<1x64xf32, #tpu.memory_space<vmem>>, %arg8: memref<64x32xf32, #tpu.memory_space<vmem>>, %arg9: memref<1x32xf32, #tpu.memory_space<vmem>>, %arg10: memref<32x4xf32, #tpu.memory_space<vmem>>, %arg11: memref<1x4xf32, #tpu.memory_space<vmem>>, %arg12: memref<2x4xf32, #tpu.memory_space<vmem>>, %arg13: memref<256x32xbf16, #tpu.memory_space<vmem>>, %arg14: memref<2x64xf32, #tpu.memory_space<vmem>>) attributes {dimension_semantics = [#tpu.dimension_semantics<arbitrary>], iteration_bounds = array<i64: 2>, scalar_prefetch = 0 : i64, scratch_operands = 2 : i64, tpu.core_type = #tpu.core_type<tc>, window_params = [{transform_indices = @transform_0, window_bounds = array<i64: 128, 256>}, {pipeline_mode = #tpu.pipeline_mode<synchronous>, transform_indices = @transform_1, window_bounds = array<i64: 256, 8>}, {transform_indices = @transform_2, window_bounds = array<i64: 2, 128>}, {pipeline_mode = #tpu.pipeline_mode<synchronous>, transform_indices = @transform_3, window_bounds = array<i64: 8, 32>}, {pipeline_mode = #tpu.pipeline_mode<synchronous>, transform_indices = @transform_4, window_bounds = array<i64: 1, 32>}, {pipeline_mode = #tpu.pipeline_mode<synchronous>, transform_indices = @transform_5, window_bounds = array<i64: 32, 64>}, {pipeline_mode = #tpu.pipeline_mode<synchronous>, transform_indices = @transform_6, window_bounds = array<i64: 1, 64>}, {pipeline_mode = #tpu.pipeline_mode<synchronous>, transform_indices = @transform_7, window_bounds = array<i64: 64, 32>}, {pipeline_mode = #tpu.pipeline_mode<synchronous>, transform_indices = @transform_8, window_bounds = array<i64: 1, 32>}, {pipeline_mode = #tpu.pipeline_mode<synchronous>, transform_indices = @transform_9, window_bounds = array<i64: 32, 4>}, {pipeline_mode = #tpu.pipeline_mode<synchronous>, transform_indices = @transform_10, window_bounds = array<i64: 1, 4>}, {pipeline_mode = #tpu.pipeline_mode<synchronous>, transform_indices = @transform_11, window_bounds = array<i64: 2, 4>}]} {
    %c0_i32 = arith.constant 0 : i32
    %0 = arith.cmpi eq, %arg0, %c0_i32 : i32
    %1 = arith.extui %0 : i1 to i32
    %c0_i32_0 = arith.constant 0 : i32
    %2 = arith.cmpi ne, %1, %c0_i32_0 : i32
    scf.if %2 {
      %c0_17 = arith.constant 0 : index
      %c0_18 = arith.constant 0 : index
      %19 = vector.load %arg2[%c0_17, %c0_18] : memref<256x8xf32, #tpu.memory_space<vmem>>, vector<256x8xf32>
      %c0_19 = arith.constant 0 : index
      %c0_20 = arith.constant 0 : index
      %20 = vector.load %arg4[%c0_19, %c0_20] : memref<8x32xf32, #tpu.memory_space<vmem>>, vector<8x32xf32>
      %cst_21 = arith.constant dense<0.000000e+00> : vector<256x32xf32>
      %21 = tpu.matmul %19, %20, %cst_21 {dimension_numbers = #tpu.dot_dimension_numbers<[1], [0], [0], [1], [0, 0, 1, 1], [], []>} : vector<256x8xf32>, vector<8x32xf32>, vector<256x32xf32> -> vector<256x32xf32>
      %22 = arith.truncf %21 : vector<256x32xf32> to vector<256x32xbf16>
      %c0_22 = arith.constant 0 : index
      %c0_23 = arith.constant 0 : index
      %23 = vector.load %arg13[%c0_22, %c0_23] : memref<256x32xbf16, #tpu.memory_space<vmem>>, vector<256x32xbf16>
      tpu.vector_store %arg13[%c0_22, %c0_23], %22 {strides = array<i32>} : memref<256x32xbf16, #tpu.memory_space<vmem>>, vector<256x32xbf16>,
      %cst_24 = arith.constant 0.000000e+00 : f32
      %24 = vector.broadcast %cst_24 : f32 to vector<2x64xf32>
      %c0_25 = arith.constant 0 : index
      %c0_26 = arith.constant 0 : index
      %25 = vector.load %arg14[%c0_25, %c0_26] : memref<2x64xf32, #tpu.memory_space<vmem>>, vector<2x64xf32>
      tpu.vector_store %arg14[%c0_25, %c0_26], %24 {strides = array<i32>} : memref<2x64xf32, #tpu.memory_space<vmem>>, vector<2x64xf32>,
    } else {
    }
    %c0 = arith.constant 0 : index
    %c0_1 = arith.constant 0 : index
    %3 = vector.load %arg1[%c0, %c0_1] : memref<128x256xbf16, #tpu.memory_space<vmem>>, vector<128x256xbf16>
    %c0_2 = arith.constant 0 : index
    %c0_3 = arith.constant 0 : index
    %4 = vector.load %arg13[%c0_2, %c0_3] : memref<256x32xbf16, #tpu.memory_space<vmem>>, vector<256x32xbf16>
    %cst = arith.constant dense<0.000000e+00> : vector<128x32xf32>
    %5 = tpu.matmul %3, %4, %cst {dimension_numbers = #tpu.dot_dimension_numbers<[1], [0], [0], [1], [0, 0, 1, 1], [], []>} : vector<128x256xbf16>, vector<256x32xbf16>, vector<128x32xf32> -> vector<128x32xf32>
    %c0_4 = arith.constant 0 : index
    %c0_5 = arith.constant 0 : index
    %6 = vector.load %arg5[%c0_4, %c0_5] : memref<1x32xf32, #tpu.memory_space<vmem>>, vector<1x32xf32>
    %7 = vector.broadcast %6 : vector<1x32xf32> to vector<128x32xf32>
    %8 = arith.addf %5, %7 : vector<128x32xf32>
    %c0_6 = arith.constant 0 : index
    %c0_7 = arith.constant 0 : index
    %9 = vector.load %arg6[%c0_6, %c0_7] : memref<32x64xf32, #tpu.memory_space<vmem>>, vector<32x64xf32>
    %cst_8 = arith.constant dense<0.000000e+00> : vector<128x64xf32>
    %10 = tpu.matmul %8, %9, %cst_8 {dimension_numbers = #tpu.dot_dimension_numbers<[1], [0], [0], [1], [0, 0, 1, 1], [], []>} : vector<128x32xf32>, vector<32x64xf32>, vector<128x64xf32> -> vector<128x64xf32>
    %c0_9 = arith.constant 0 : index
    %c0_10 = arith.constant 0 : index
    %11 = vector.load %arg14[%c0_9, %c0_10] : memref<2x64xf32, #tpu.memory_space<vmem>>, vector<2x64xf32>
    %c0_11 = arith.constant 0 : index
    %c0_12 = arith.constant 0 : index
    %12 = vector.load %arg3[%c0_11, %c0_12] : memref<2x128xf32, #tpu.memory_space<vmem>>, vector<2x128xf32>
    %cst_13 = arith.constant dense<0.000000e+00> : vector<2x64xf32>
    %13 = tpu.matmul %12, %10, %cst_13 {dimension_numbers = #tpu.dot_dimension_numbers<[1], [0], [0], [1], [0, 0, 1, 1], [], []>} : vector<2x128xf32>, vector<128x64xf32>, vector<2x64xf32> -> vector<2x64xf32>
    %14 = arith.addf %11, %13 : vector<2x64xf32>
    %c0_14 = arith.constant 0 : index
    %c0_15 = arith.constant 0 : index
    %15 = vector.load %arg14[%c0_14, %c0_15] : memref<2x64xf32, #tpu.memory_space<vmem>>, vector<2x64xf32>
    tpu.vector_store %arg14[%c0_14, %c0_15], %14 {strides = array<i32>} : memref<2x64xf32, #tpu.memory_space<vmem>>, vector<2x64xf32>,
    %c1_i32 = arith.constant 1 : i32
    %16 = arith.cmpi eq, %arg0, %c1_i32 : i32
    %17 = arith.extui %16 : i1 to i32
    %c0_i32_16 = arith.constant 0 : i32
    %18 = arith.cmpi ne, %17, %c0_i32_16 : i32
    scf.if %18 {
      %c0_17 = arith.constant 0 : index
      %c0_18 = arith.constant 0 : index
      %19 = vector.load %arg14[%c0_17, %c0_18] : memref<2x64xf32, #tpu.memory_space<vmem>>, vector<2x64xf32>
      %c0_19 = arith.constant 0 : index
      %c0_20 = arith.constant 0 : index
      %20 = vector.load %arg7[%c0_19, %c0_20] : memref<1x64xf32, #tpu.memory_space<vmem>>, vector<1x64xf32>
      %21 = vector.broadcast %20 : vector<1x64xf32> to vector<2x64xf32>
      %22 = arith.addf %19, %21 : vector<2x64xf32>
      %c0_21 = arith.constant 0 : index
      %c0_22 = arith.constant 0 : index
      %23 = vector.load %arg8[%c0_21, %c0_22] : memref<64x32xf32, #tpu.memory_space<vmem>>, vector<64x32xf32>
      %cst_23 = arith.constant dense<0.000000e+00> : vector<2x32xf32>
      %24 = tpu.matmul %22, %23, %cst_23 {dimension_numbers = #tpu.dot_dimension_numbers<[1], [0], [0], [1], [0, 0, 1, 1], [], []>} : vector<2x64xf32>, vector<64x32xf32>, vector<2x32xf32> -> vector<2x32xf32>
      %c0_24 = arith.constant 0 : index
      %c0_25 = arith.constant 0 : index
      %25 = vector.load %arg9[%c0_24, %c0_25] : memref<1x32xf32, #tpu.memory_space<vmem>>, vector<1x32xf32>
      %26 = vector.broadcast %25 : vector<1x32xf32> to vector<2x32xf32>
      %27 = arith.addf %24, %26 : vector<2x32xf32>
      %cst_26 = arith.constant 0.000000e+00 : f32
      %28 = vector.broadcast %cst_26 : f32 to vector<2x32xf32>
      %29 = arith.maximumf %27, %28 : vector<2x32xf32>
      %c0_27 = arith.constant 0 : index
      %c0_28 = arith.constant 0 : index
      %30 = vector.load %arg10[%c0_27, %c0_28] : memref<32x4xf32, #tpu.memory_space<vmem>>, vector<32x4xf32>
      %cst_29 = arith.constant dense<0.000000e+00> : vector<2x4xf32>
      %31 = tpu.matmul %29, %30, %cst_29 {dimension_numbers = #tpu.dot_dimension_numbers<[1], [0], [0], [1], [0, 0, 1, 1], [], []>} : vector<2x32xf32>, vector<32x4xf32>, vector<2x4xf32> -> vector<2x4xf32>
      %c0_30 = arith.constant 0 : index
      %c0_31 = arith.constant 0 : index
      %32 = vector.load %arg11[%c0_30, %c0_31] : memref<1x4xf32, #tpu.memory_space<vmem>>, vector<1x4xf32>
      %33 = vector.broadcast %32 : vector<1x4xf32> to vector<2x4xf32>
      %34 = arith.addf %31, %33 : vector<2x4xf32>
      %35 = arith.negf %34 : vector<2x4xf32>
      %36 = math.exp %35 : vector<2x4xf32>
      %cst_32 = arith.constant 1.000000e+00 : f32
      %37 = vector.broadcast %cst_32 : f32 to vector<2x4xf32>
      %38 = arith.addf %37, %36 : vector<2x4xf32>
      %39 = arith.divf %37, %38 : vector<2x4xf32>
      %c0_33 = arith.constant 0 : index
      %c0_34 = arith.constant 0 : index
      %40 = vector.load %arg12[%c0_33, %c0_34] : memref<2x4xf32, #tpu.memory_space<vmem>>, vector<2x4xf32>
      tpu.vector_store %arg12[%c0_33, %c0_34], %39 {strides = array<i32>} : memref<2x4xf32, #tpu.memory_space<vmem>>, vector<2x4xf32>,
    } else {
    }
    return
  }
  func.func @transform_0(%arg0: i32) -> (i32, i32) {
    %c0_i32 = arith.constant 0 : i32
    %c0_i32_0 = arith.constant 0 : i32
    return %arg0, %c0_i32 : i32, i32
  }
  func.func @transform_1(%arg0: i32) -> (i32, i32) {
    %c0_i32 = arith.constant 0 : i32
    %c0_i32_0 = arith.constant 0 : i32
    %c0_i32_1 = arith.constant 0 : i32
    return %c0_i32, %c0_i32_0 : i32, i32
  }
  func.func @transform_2(%arg0: i32) -> (i32, i32) {
    %c0_i32 = arith.constant 0 : i32
    %c0_i32_0 = arith.constant 0 : i32
    return %c0_i32, %arg0 : i32, i32
  }
  func.func @transform_3(%arg0: i32) -> (i32, i32) {
    %c0_i32 = arith.constant 0 : i32
    %c0_i32_0 = arith.constant 0 : i32
    %c0_i32_1 = arith.constant 0 : i32
    return %c0_i32, %c0_i32_0 : i32, i32
  }
  func.func @transform_4(%arg0: i32) -> (i32, i32) {
    %c0_i32 = arith.constant 0 : i32
    %c0_i32_0 = arith.constant 0 : i32
    %c0_i32_1 = arith.constant 0 : i32
    return %c0_i32, %c0_i32_0 : i32, i32
  }
  func.func @transform_5(%arg0: i32) -> (i32, i32) {
    %c0_i32 = arith.constant 0 : i32
    %c0_i32_0 = arith.constant 0 : i32
    %c0_i32_1 = arith.constant 0 : i32
    return %c0_i32, %c0_i32_0 : i32, i32
  }
  func.func @transform_6(%arg0: i32) -> (i32, i32) {
    %c0_i32 = arith.constant 0 : i32
    %c0_i32_0 = arith.constant 0 : i32
    %c0_i32_1 = arith.constant 0 : i32
    return %c0_i32, %c0_i32_0 : i32, i32
  }
  func.func @transform_7(%arg0: i32) -> (i32, i32) {
    %c0_i32 = arith.constant 0 : i32
    %c0_i32_0 = arith.constant 0 : i32
    %c0_i32_1 = arith.constant 0 : i32
    return %c0_i32, %c0_i32_0 : i32, i32
  }
  func.func @transform_8(%arg0: i32) -> (i32, i32) {
    %c0_i32 = arith.constant 0 : i32
    %c0_i32_0 = arith.constant 0 : i32
    %c0_i32_1 = arith.constant 0 : i32
    return %c0_i32, %c0_i32_0 : i32, i32
  }
  func.func @transform_9(%arg0: i32) -> (i32, i32) {
    %c0_i32 = arith.constant 0 : i32
    %c0_i32_0 = arith.constant 0 : i32
    %c0_i32_1 = arith.constant 0 : i32
    return %c0_i32, %c0_i32_0 : i32, i32
  }
  func.func @transform_10(%arg0: i32) -> (i32, i32) {
    %c0_i32 = arith.constant 0 : i32
    %c0_i32_0 = arith.constant 0 : i32
    %c0_i32_1 = arith.constant 0 : i32
    return %c0_i32, %c0_i32_0 : i32, i32
  }
  func.func @transform_11(%arg0: i32) -> (i32, i32) {
    %c0_i32 = arith.constant 0 : i32
    %c0_i32_0 = arith.constant 0 : i32
    %c0_i32_1 = arith.constant 0 : i32
    return %c0_i32, %c0_i32_0 : i32, i32
  }
}

</mosaic_0001>

<bundles_post_ra>
// kernel: tpu_custom_call.1
= control target key start
LH: loop header
LB: loop body
LE: loop exit
PB: predicated region body
PF: predicated region fallthrough
CT: control target
= control target key end

     0   :  { %16 = vsyncpa [#allocation5], 0  ;;  %s1708_s17 = smov 0   ;;  %s2031_s0 = inlined_call_operand.vmem [shape: bf16[256,256], index: 0, kind: input, shape index: {}]   ;;  %s2032_s1 = inlined_call_operand.vmem [shape: f32[256,8], index: 1, kind: input, shape index: {}]   ;;  %s2033_s2 = inlined_call_operand.vmem [shape: f32[2,256], index: 2, kind: input, shape index: {}]   ;;  %s2034_s3 = inlined_call_operand.vmem [shape: f32[8,32], index: 3, kind: input, shape index: {}]   ;;  %s2035_s4 = inlined_call_operand.vmem [shape: f32[1,32], index: 4, kind: input, shape index: {}]   ;;  %s2036_s5 = inlined_call_operand.vmem [shape: f32[32,64], index: 5, kind: input, shape index: {}]   ;;  %s2037_s6 = inlined_call_operand.vmem [shape: f32[1,64], index: 6, kind: input, shape index: {}]   ;;  %s2038_s7 = inlined_call_operand.vmem [shape: f32[64,32], index: 7, kind: input, shape index: {}]   ;;  %s2039_s8 = inlined_call_operand.vmem [shape: f32[1,32], index: 8, kind: input, shape index: {}]   ;;  %s2040_s9 = inlined_call_operand.vmem [shape: f32[32,4], index: 9, kind: input, shape index: {}]   ;;  %s2041_s10 = inlined_call_operand.vmem [shape: f32[1,4], index: 10, kind: input, shape index: {}]   ;;  %s2042_s11 = inlined_call_operand.hbm [shape: f32[2,4], index: 11, kind: output, shape index: {}]  }
   0x1 LB: > { %s1714_s18 = sadd.s32 4294967295, %s1644_s17   ;;  %p1340_p0 = scmp.ge.s32.totalorder %s1644_s17, 1  ;;  %s1644_s17 = sphi %s1708_s17, %s22_s17  }
   0x2   : > { %p344_p1 = scmp.lt.s32.totalorder %s1644_s17, 3 }
   0x4   : > { %p345_p2 = pnand %p1340_p0, %p344_p1 }
   0x5   : > { %s1341_s19 = sshll.u32 (!%p345_p2), %s1714_s18, 4  ;;  %p391_p3 = scmp.lt.s32.totalorder (!%p345_p2), %s1714_s18, 1 }
   0x6   : > { %348 = sbr.rel (%p345_p2) target bundleno = 1103 (0x44f), region = 64  ;;  %p385_p4 = scmp.lt.s32.totalorder (!%p345_p2), %s1341_s19, 31 }
   0x7   : > { %p1345_p5 = scmp.ne.s32.totalorder (!%p345_p2), %s1714_s18, 0 }
   0xb   : > { %s392_s20 = scalar_select %p391_p3, %s1714_s18, 1 }
   0xc   : > { %s2044_s19 = smov (!%p385_p4, %s1341_s19), 31  ;;  %398 = sbr.rel (%p1345_p5) target bundleno = 211 (0xd3), region = 68 }
   0xd   : > { %s1344_s21 = sshll.u32 %s392_s20, 1  ;;  %s1530_s22 = sshll.u32 %s2044_s19, 3 }
   0xe   : > { %s1724_s25 = scalar_lea.vmem %s2033_s2, %s1344_s21  ;;  %s1729_s28 = scalar_lea.vmem %s2031_s0, %s1530_s22 }
  0x11   : > { %v431_v0 = vld [vmem:[%s2034_s3] sm:$0xff]  ;;  %vm432_vm0 = vcmask 64512   ;;  %v416_v5 = vld [vmem:[%s2032_s1 + $0x88] sm:$0xff]  ;;  %v417_v9 = vld [vmem:[%s2032_s1 + $0x90] sm:$0xff]  ;;  %vm674_vm1 = vcmask 257024   ;;  %vm707_vm2 = vcmask 517120  }
  0x12   : > { %v415_v1 = vld [vmem:[%s2032_s1 + $0x80] sm:$0xff]  ;;  %1564 = vmatpush.msra.mxu2 %v431_v0  ;;  %1565 = vmatpush.msra.mxu3 %v431_v0  ;;  %v424_v6 = vld [vmem:[%s2032_s1 + $0xc8] sm:$0xff]  ;;  %v425_v10 = vld [vmem:[%s2032_s1 + $0xd0] sm:$0xff] }
  0x13   : > { %v423_v2 = vld [vmem:[%s2032_s1 + $0xc0] sm:$0xff]  ;;  %1362 = vmatmul.msk.f32.vlgmr.msra.gmra.mxu2 %vm432_vm0, %v415_v1  ;;  %544 = vmatpush.msra.mxu0 %v431_v0  ;;  %v400_v7 = vld [vmem:[%s2032_s1 + $0x8] sm:$0xff]  ;;  %v401_v11 = vld [vmem:[%s2032_s1 + $0x10] sm:$0xff] }
  0x14   : > { %v399_v3 = vld [vmem:[%s2032_s1] sm:$0xff]  ;;  %1370 = vmatmul.msk.f32.vlgmr.msra.gmra.mxu3 %vm432_vm0, %v423_v2  ;;  %1563 = vmatpush.msra.mxu1 %v431_v0  ;;  %v408_v8 = vld [vmem:[%s2032_s1 + $0x48] sm:$0xff]  ;;  %v409_v12 = vld [vmem:[%s2032_s1 + $0x50] sm:$0xff] }
  0x15   : > { %v407_v4 = vld [vmem:[%s2032_s1 + $0x40] sm:$0xff]  ;;  %1346 = vmatmul.msk.f32.vlgmr.msra.gmra.mxu0 %vm432_vm0, %v399_v3  ;;  %v418_v13 = vld [vmem:[%s2032_s1 + $0x98] sm:$0xff]  ;;  %v420_v21 = vld [vmem:[%s2032_s1 + $0xa8] sm:$0xff] }
  0x16   : > { %1354 = vmatmul.msk.f32.vlgmr.msra.gmra.mxu1 %vm432_vm0, %v407_v4  ;;  %v426_v14 = vld [vmem:[%s2032_s1 + $0xd8] sm:$0xff]  ;;  %v419_v17 = vld [vmem:[%s2032_s1 + $0xa0] sm:$0xff]  ;;  %v428_v22 = vld [vmem:[%s2032_s1 + $0xe8] sm:$0xff] }
  0x17   : > { %v402_v15 = vld [vmem:[%s2032_s1 + $0x18] sm:$0xff]  ;;  %v427_v18 = vld [vmem:[%s2032_s1 + $0xe0] sm:$0xff]  ;;  %v404_v23 = vld [vmem:[%s2032_s1 + $0x28] sm:$0xff] }
  0x18   : > { %v410_v16 = vld [vmem:[%s2032_s1 + $0x58] sm:$0xff]  ;;  %v403_v19 = vld [vmem:[%s2032_s1 + $0x20] sm:$0xff]  ;;  %v412_v24 = vld [vmem:[%s2032_s1 + $0x68] sm:$0xff] }
  0x19   : > { %v411_v20 = vld [vmem:[%s2032_s1 + $0x60] sm:$0xff]  ;;  %v421_v25 = vld [vmem:[%s2032_s1 + $0xb0] sm:$0xff]  ;;  %v422_v29 = vld [vmem:[%s2032_s1 + $0xb8] sm:$0xff] }
  0x1a   : > { %v429_v26 = vld [vmem:[%s2032_s1 + $0xf0] sm:$0xff]  ;;  %v430_v30 = vld [vmem:[%s2032_s1 + $0xf8] sm:$0xff] }
  0x1b   : > { %1363 = vmatmul.msk.f32.gmra.mxu2 %vm432_vm0, %v416_v5  ;;  %v405_v27 = vld [vmem:[%s2032_s1 + $0x30] sm:$0xff]  ;;  %v406_v31 = vld [vmem:[%s2032_s1 + $0x38] sm:$0xff]  ;;  %v1646_v5 = vmov 0.0  }
  0x1c   : > { %1371 = vmatmul.msk.f32.gmra.mxu3 %vm432_vm0, %v424_v6  ;;  %v413_v28 = vld [vmem:[%s2032_s1 + $0x70] sm:$0xff]  ;;  %v414_v32 = vld [vmem:[%s2032_s1 + $0x78] sm:$0xff]  ;;  %708 = vst.msk [vmem:[#allocation3] sm:$0x3] %vm707_vm2, %v1646_v5 }
  0x1d   : > { %1347 = vmatmul.msk.f32.gmra.mxu0 %vm432_vm0, %v400_v7 }
  0x1e   : > { %1355 = vmatmul.msk.f32.gmra.mxu1 %vm432_vm0, %v408_v8 }
  0x23   : > { %1364 = vmatmul.msk.f32.gmra.mxu2 %vm432_vm0, %v417_v9 }
  0x24   : > { %1372 = vmatmul.msk.f32.gmra.mxu3 %vm432_vm0, %v425_v10 }
  0x25   : > { %1348 = vmatmul.msk.f32.gmra.mxu0 %vm432_vm0, %v401_v11 }
  0x26   : > { %1356 = vmatmul.msk.f32.gmra.mxu1 %vm432_vm0, %v409_v12 }
  0x2b   : > { %1365 = vmatmul.msk.f32.gmra.mxu2 %vm432_vm0, %v418_v13 }
  0x2c   : > { %1373 = vmatmul.msk.f32.gmra.mxu3 %vm432_vm0, %v426_v14 }
  0x2d   : > { %1349 = vmatmul.msk.f32.gmra.mxu0 %vm432_vm0, %v402_v15 }
  0x2e   : > { %1357 = vmatmul.msk.f32.gmra.mxu1 %vm432_vm0, %v410_v16 }
  0x33   : > { %1366 = vmatmul.msk.f32.gmra.mxu2 %vm432_vm0, %v419_v17 }
  0x34   : > { %1374 = vmatmul.msk.f32.gmra.mxu3 %vm432_vm0, %v427_v18 }
  0x35   : > { %1350 = vmatmul.msk.f32.gmra.mxu0 %vm432_vm0, %v403_v19 }
  0x36   : > { %1358 = vmatmul.msk.f32.gmra.mxu1 %vm432_vm0, %v411_v20 }
  0x3b   : > { %1367 = vmatmul.msk.f32.gmra.mxu2 %vm432_vm0, %v420_v21 }
  0x3c   : > { %1375 = vmatmul.msk.f32.gmra.mxu3 %vm432_vm0, %v428_v22 }
  0x3d   : > { %1351 = vmatmul.msk.f32.gmra.mxu0 %vm432_vm0, %v404_v23 }
  0x3e   : > { %1359 = vmatmul.msk.f32.gmra.mxu1 %vm432_vm0, %v412_v24 }
  0x43   : > { %1368 = vmatmul.msk.f32.gmra.mxu2 %vm432_vm0, %v421_v25 }
  0x44   : > { %1376 = vmatmul.msk.f32.gmra.mxu3 %vm432_vm0, %v429_v26 }
  0x45   : > { %1352 = vmatmul.msk.f32.gmra.mxu0 %vm432_vm0, %v405_v27 }
  0x46   : > { %1360 = vmatmul.msk.f32.gmra.mxu1 %vm432_vm0, %v413_v28 }
  0x4b   : > { %1369 = vmatmul.msk.f32.gmra.mxu2 %vm432_vm0, %v422_v29 }
  0x4c   : > { %1377 = vmatmul.msk.f32.gmra.mxu3 %vm432_vm0, %v430_v30 }
  0x4d   : > { %1353 = vmatmul.msk.f32.gmra.mxu0 %vm432_vm0, %v406_v31 }
  0x4e   : > { %1361 = vmatmul.msk.f32.gmra.mxu1 %vm432_vm0, %v414_v32 }
  0x92   : > { %v546_v33 = vpop.f32.mrf.mxu0 }
  0x93   : > { %v570_v34 = vpop.f32.mrf.mxu1  ;;  %v642_v35 = vpack.c.bf16 %v546_v33, %v546_v33 }
  0x94   : > { %v650_v36 = vpack.c.bf16 %v570_v34, %v570_v34 }
  0x95   : > { %675 = vst.msk [vmem:[#allocation2] sm:$0xf] %vm674_vm1, %v642_v35 }
  0x96   : > { %683 = vst.msk [vmem:[#allocation2 + $0x20] sm:$0xf] %vm674_vm1, %v650_v36  ;;  %v594_v37 = vpop.f32.mrf.mxu2 }
  0x97   : > { %v618_v38 = vpop.f32.mrf.mxu3  ;;  %v658_v39 = vpack.c.bf16 %v594_v37, %v594_v37 }
  0x98   : > { %v666_v40 = vpack.c.bf16 %v618_v38, %v618_v38 }
  0x99   : > { %691 = vst.msk [vmem:[#allocation2 + $0x40] sm:$0xf] %vm674_vm1, %v658_v39 }
  0x9a   : > { %699 = vst.msk [vmem:[#allocation2 + $0x60] sm:$0xf] %vm674_vm1, %v666_v40  ;;  %v549_v41 = vpop.f32.mrf.mxu0 }
  0x9b   : > { %v573_v42 = vpop.f32.mrf.mxu1  ;;  %v643_v43 = vpack.c.bf16 %v549_v41, %v549_v41 }
  0x9c   : > { %v651_v44 = vpack.c.bf16 %v573_v42, %v573_v42 }
  0x9d   : > { %676 = vst.msk [vmem:[#allocation2 + $0x4] sm:$0xf] %vm674_vm1, %v643_v43 }
  0x9e   : > { %684 = vst.msk [vmem:[#allocation2 + $0x24] sm:$0xf] %vm674_vm1, %v651_v44  ;;  %v597_v45 = vpop.f32.mrf.mxu2 }
  0x9f   : > { %v621_v46 = vpop.f32.mrf.mxu3  ;;  %v659_v47 = vpack.c.bf16 %v597_v45, %v597_v45 }
  0xa0   : > { %v667_v48 = vpack.c.bf16 %v621_v46, %v621_v46 }
  0xa1   : > { %692 = vst.msk [vmem:[#allocation2 + $0x44] sm:$0xf] %vm674_vm1, %v659_v47 }
  0xa2   : > { %700 = vst.msk [vmem:[#allocation2 + $0x64] sm:$0xf] %vm674_vm1, %v667_v48  ;;  %v552_v49 = vpop.f32.mrf.mxu0 }
  0xa3   : > { %v576_v50 = vpop.f32.mrf.mxu1  ;;  %v644_v51 = vpack.c.bf16 %v552_v49, %v552_v49 }
  0xa4   : > { %v652_v52 = vpack.c.bf16 %v576_v50, %v576_v50 }
  0xa5   : > { %677 = vst.msk [vmem:[#allocation2 + $0x8] sm:$0xf] %vm674_vm1, %v644_v51 }
  0xa6   : > { %685 = vst.msk [vmem:[#allocation2 + $0x28] sm:$0xf] %vm674_vm1, %v652_v52  ;;  %v600_v53 = vpop.f32.mrf.mxu2 }
  0xa7   : > { %v624_v54 = vpop.f32.mrf.mxu3  ;;  %v660_v55 = vpack.c.bf16 %v600_v53, %v600_v53 }
  0xa8   : > { %v668_v56 = vpack.c.bf16 %v624_v54, %v624_v54 }
  0xa9   : > { %693 = vst.msk [vmem:[#allocation2 + $0x48] sm:$0xf] %vm674_vm1, %v660_v55 }
  0xaa   : > { %701 = vst.msk [vmem:[#allocation2 + $0x68] sm:$0xf] %vm674_vm1, %v668_v56  ;;  %v555_v57 = vpop.f32.mrf.mxu0 }
  0xab   : > { %v579_v58 = vpop.f32.mrf.mxu1  ;;  %v645_v59 = vpack.c.bf16 %v555_v57, %v555_v57 }
  0xac   : > { %v653_v60 = vpack.c.bf16 %v579_v58, %v579_v58 }
  0xad   : > { %678 = vst.msk [vmem:[#allocation2 + $0xc] sm:$0xf] %vm674_vm1, %v645_v59 }
  0xae   : > { %686 = vst.msk [vmem:[#allocation2 + $0x2c] sm:$0xf] %vm674_vm1, %v653_v60  ;;  %v603_v61 = vpop.f32.mrf.mxu2 }
  0xaf   : > { %v627_v62 = vpop.f32.mrf.mxu3  ;;  %v661_v63 = vpack.c.bf16 %v603_v61, %v603_v61 }
  0xb0   : > { %v669_v0 = vpack.c.bf16 %v627_v62, %v627_v62 }
  0xb1   : > { %694 = vst.msk [vmem:[#allocation2 + $0x4c] sm:$0xf] %vm674_vm1, %v661_v63 }
  0xb2   : > { %702 = vst.msk [vmem:[#allocation2 + $0x6c] sm:$0xf] %vm674_vm1, %v669_v0  ;;  %v558_v1 = vpop.f32.mrf.mxu0 }
  0xb3   : > { %v582_v2 = vpop.f32.mrf.mxu1  ;;  %v646_v3 = vpack.c.bf16 %v558_v1, %v558_v1 }
  0xb4   : > { %v654_v4 = vpack.c.bf16 %v582_v2, %v582_v2 }
  0xb5   : > { %679 = vst.msk [vmem:[#allocation2 + $0x10] sm:$0xf] %vm674_vm1, %v646_v3 }
  0xb6   : > { %687 = vst.msk [vmem:[#allocation2 + $0x30] sm:$0xf] %vm674_vm1, %v654_v4  ;;  %v606_v6 = vpop.f32.mrf.mxu2 }
  0xb7   : > { %v630_v7 = vpop.f32.mrf.mxu3  ;;  %v662_v8 = vpack.c.bf16 %v606_v6, %v606_v6 }
  0xb8   : > { %v670_v9 = vpack.c.bf16 %v630_v7, %v630_v7 }
  0xb9   : > { %695 = vst.msk [vmem:[#allocation2 + $0x50] sm:$0xf] %vm674_vm1, %v662_v8 }
  0xba   : > { %703 = vst.msk [vmem:[#allocation2 + $0x70] sm:$0xf] %vm674_vm1, %v670_v9  ;;  %v561_v10 = vpop.f32.mrf.mxu0 }
  0xbb   : > { %v585_v11 = vpop.f32.mrf.mxu1  ;;  %v647_v12 = vpack.c.bf16 %v561_v10, %v561_v10 }
  0xbc   : > { %v655_v13 = vpack.c.bf16 %v585_v11, %v585_v11 }
  0xbd   : > { %680 = vst.msk [vmem:[#allocation2 + $0x14] sm:$0xf] %vm674_vm1, %v647_v12 }
  0xbe   : > { %688 = vst.msk [vmem:[#allocation2 + $0x34] sm:$0xf] %vm674_vm1, %v655_v13  ;;  %v609_v14 = vpop.f32.mrf.mxu2 }
  0xbf   : > { %v633_v15 = vpop.f32.mrf.mxu3  ;;  %v663_v16 = vpack.c.bf16 %v609_v14, %v609_v14 }
  0xc0   : > { %v671_v17 = vpack.c.bf16 %v633_v15, %v633_v15 }
  0xc1   : > { %696 = vst.msk [vmem:[#allocation2 + $0x54] sm:$0xf] %vm674_vm1, %v663_v16 }
  0xc2   : > { %704 = vst.msk [vmem:[#allocation2 + $0x74] sm:$0xf] %vm674_vm1, %v671_v17  ;;  %v564_v18 = vpop.f32.mrf.mxu0 }
  0xc3   : > { %v588_v19 = vpop.f32.mrf.mxu1  ;;  %v648_v20 = vpack.c.bf16 %v564_v18, %v564_v18 }
  0xc4   : > { %v656_v21 = vpack.c.bf16 %v588_v19, %v588_v19 }
  0xc5   : > { %681 = vst.msk [vmem:[#allocation2 + $0x18] sm:$0xf] %vm674_vm1, %v648_v20 }
  0xc6   : > { %689 = vst.msk [vmem:[#allocation2 + $0x38] sm:$0xf] %vm674_vm1, %v656_v21  ;;  %v612_v22 = vpop.f32.mrf.mxu2 }
  0xc7   : > { %v636_v23 = vpop.f32.mrf.mxu3  ;;  %v664_v24 = vpack.c.bf16 %v612_v22, %v612_v22 }
  0xc8   : > { %v672_v25 = vpack.c.bf16 %v636_v23, %v636_v23 }
  0xc9   : > { %697 = vst.msk [vmem:[#allocation2 + $0x58] sm:$0xf] %vm674_vm1, %v664_v24 }
  0xca   : > { %705 = vst.msk [vmem:[#allocation2 + $0x78] sm:$0xf] %vm674_vm1, %v672_v25  ;;  %v567_v26 = vpop.f32.mrf.mxu0 }
  0xcb   : > { %v591_v27 = vpop.f32.mrf.mxu1  ;;  %v649_v28 = vpack.c.bf16 %v567_v26, %v567_v26 }
  0xcc   : > { %v657_v29 = vpack.c.bf16 %v591_v27, %v591_v27 }
  0xcd   : > { %682 = vst.msk [vmem:[#allocation2 + $0x1c] sm:$0xf] %vm674_vm1, %v649_v28 }
  0xce   : > { %690 = vst.msk [vmem:[#allocation2 + $0x3c] sm:$0xf] %vm674_vm1, %v657_v29  ;;  %v615_v30 = vpop.f32.mrf.mxu2 }
  0xcf   : > { %v639_v31 = vpop.f32.mrf.mxu3  ;;  %v665_v32 = vpack.c.bf16 %v615_v30, %v615_v30 }
  0xd0   : > { %v673_v33 = vpack.c.bf16 %v639_v31, %v639_v31 }
  0xd1   : > { %698 = vst.msk [vmem:[#allocation2 + $0x5c] sm:$0xf] %vm674_vm1, %v665_v32 }
  0xd2   : > { %706 = vst.msk [vmem:[#allocation2 + $0x7c] sm:$0xf] %vm674_vm1, %v673_v33 }
  0xd3 PF: > { %v1553_v36 = vld [vmem:[#allocation2 + $0x30] sm:$0xff]  ;;  %v1552_v38 = vld [vmem:[#allocation2 + $0x28] sm:$0xff]  ;;  %v1551_v40 = vld [vmem:[#allocation2 + $0x20] sm:$0xff]  ;;  %vm1039_vm3 = vcmask 261120   ;;  %vm1176_vm4 = vcmask 517120   ;;  %p1522_p6 = scmp.ne.s32.totalorder %s1714_s18, 1 }
  0xd4   : > { %v1561_v37 = vld [vmem:[#allocation2 + $0x70] sm:$0xff]  ;;  %v1560_v39 = vld [vmem:[#allocation2 + $0x68] sm:$0xff]  ;;  %v1559_v41 = vld [vmem:[#allocation2 + $0x60] sm:$0xff] }
  0xd5   : > { %v1554_v34 = vld [vmem:[#allocation2 + $0x38] sm:$0xff]  ;;  %v1549_v44 = vld [vmem:[#allocation2 + $0x10] sm:$0xff]  ;;  %v1548_v46 = vld [vmem:[#allocation2 + $0x8] sm:$0xff] }
  0xd6   : > { %937 = vmatpush.bf16.msra.mxu0 %v1554_v34  ;;  %1566 = vmatpush.bf16.msra.mxu3 %v1554_v34  ;;  %v1550_v42 = vld [vmem:[#allocation2 + $0x18] sm:$0xff]  ;;  %v1557_v45 = vld [vmem:[#allocation2 + $0x50] sm:$0xff]  ;;  %v1556_v47 = vld [vmem:[#allocation2 + $0x48] sm:$0xff] }
  0xd7   : > { %v1547_v48 = vld [vmem:[#allocation2] sm:$0xff]  ;;  %v1532_v51 = vld [vmem:[%s1729_s28 + $0x4] sm:$0xf0]  ;;  %v1382_v53 = vld [vmem:[%s1729_s28 + $0x8] sm:$0xf0] }
  0xd8   : > { %v1558_v43 = vld [vmem:[#allocation2 + $0x58] sm:$0xff]  ;;  %v1555_v49 = vld [vmem:[#allocation2 + $0x40] sm:$0xff]  ;;  %v1544_v55 = vld [vmem:[%s1729_s28 + $0x64] sm:$0xf0] }
  0xd9   : > { %v1562_v35 = vld [vmem:[#allocation2 + $0x78] sm:$0xff]  ;;  %v1380_v50 = vld [vmem:[%s1729_s28] sm:$0xf]  ;;  %v1531_v52 = vld [vmem:[%s1729_s28 + $0x4] sm:$0xf] }
  0xda   : > { %986 = vmatpush.bf16.msra.mxu1 %v1562_v35  ;;  %938 = vmatpush.bf16.msra.mxu0 %v1553_v36  ;;  %v1428_v54 = vld [vmem:[%s1729_s28 + $0x60] sm:$0xf]  ;;  %v1381_v56 = vor.u32 %v1532_v51, %v1380_v50  ;;  %v1385_v57 = vor.u32 %v1531_v52, %v1382_v53  ;;  %v1388_v59 = vld [vmem:[%s1729_s28 + $0x10] sm:$0xf]  ;;  %v1534_v60 = vld [vmem:[%s1729_s28 + $0x14] sm:$0xf0] }
  0xdb   : > { %1567 = vmatpush.bf16.msra.mxu3 %v1553_v36  ;;  %v1429_v58 = vor.u32 %v1544_v55, %v1428_v54  ;;  %v1533_v61 = vld [vmem:[%s1729_s28 + $0x14] sm:$0xf]  ;;  %v1390_v62 = vld [vmem:[%s1729_s28 + $0x18] sm:$0xf0]  ;;  %v1436_v63 = vld [vmem:[%s1729_s28 + $0x70] sm:$0xf]  ;;  %v1389_v1 = vor.u32 %v1534_v60, %v1388_v59 }
  0xdc   : > { %v1546_v0 = vld [vmem:[%s1729_s28 + $0x74] sm:$0xf0]  ;;  %v1393_v2 = vor.u32 %v1533_v61, %v1390_v62  ;;  %v1396_v4 = vld [vmem:[%s1729_s28 + $0x20] sm:$0xf]  ;;  %v1536_v5 = vld [vmem:[%s1729_s28 + $0x24] sm:$0xf0] }
  0xdd   : > { %v1437_v3 = vor.u32 %v1546_v0, %v1436_v63  ;;  %v1535_v6 = vld [vmem:[%s1729_s28 + $0x24] sm:$0xf]  ;;  %v1398_v7 = vld [vmem:[%s1729_s28 + $0x28] sm:$0xf0]  ;;  %v1397_v10 = vor.u32 %v1536_v5, %v1396_v4  ;;  %v1404_v13 = vld [vmem:[%s1729_s28 + $0x30] sm:$0xf] }
  0xde   : > { %987 = vmatpush.bf16.msra.mxu1 %v1561_v37  ;;  %939 = vmatpush.bf16.msra.mxu0 %v1552_v38  ;;  %v1543_v8 = vld [vmem:[%s1729_s28 + $0x64] sm:$0xf]  ;;  %v1430_v9 = vld [vmem:[%s1729_s28 + $0x68] sm:$0xf0]  ;;  %v1401_v11 = vor.u32 %v1535_v6, %v1398_v7  ;;  %v1538_v14 = vld [vmem:[%s1729_s28 + $0x34] sm:$0xf0] }
  0xdf   : > { %1568 = vmatpush.bf16.msra.mxu3 %v1552_v38  ;;  %v1433_v12 = vor.u32 %v1543_v8, %v1430_v9  ;;  %v1537_v15 = vld [vmem:[%s1729_s28 + $0x34] sm:$0xf]  ;;  %v1406_v16 = vld [vmem:[%s1729_s28 + $0x38] sm:$0xf0]  ;;  %v1405_v19 = vor.u32 %v1538_v14, %v1404_v13  ;;  %v1412_v23 = vld [vmem:[%s1729_s28 + $0x40] sm:$0xf] }
  0xe0   : > { %v1545_v17 = vld [vmem:[%s1729_s28 + $0x74] sm:$0xf]  ;;  %v1438_v18 = vld [vmem:[%s1729_s28 + $0x78] sm:$0xf0]  ;;  %v1409_v20 = vor.u32 %v1537_v15, %v1406_v16  ;;  %v1540_v24 = vld [vmem:[%s1729_s28 + $0x44] sm:$0xf0] }
  0xe1   : > { %v1441_v21 = vor.u32 %v1545_v17, %v1438_v18  ;;  %v1038_v22 = vld [vmem:[%s2036_s5 + $0x18] sm:$0xff]  ;;  %v1539_v25 = vld [vmem:[%s1729_s28 + $0x44] sm:$0xf]  ;;  %v1414_v26 = vld [vmem:[%s1729_s28 + $0x48] sm:$0xf0]  ;;  %v1413_v27 = vor.u32 %v1540_v24, %v1412_v23 }
  0xe2   : > { %988 = vmatpush.bf16.msra.mxu1 %v1560_v39  ;;  %940 = vmatpush.bf16.msra.mxu0 %v1551_v40  ;;  %v1417_v28 = vor.u32 %v1539_v25, %v1414_v26  ;;  %v1420_v29 = vld [vmem:[%s1729_s28 + $0x50] sm:$0xf]  ;;  %v1542_v30 = vld [vmem:[%s1729_s28 + $0x54] sm:$0xf0]  ;;  %v1541_v31 = vld [vmem:[%s1729_s28 + $0x54] sm:$0xf] }
  0xe3   : > { %1569 = vmatpush.bf16.msra.mxu3 %v1551_v40  ;;  %1100 = vmatpush.msra.mxu2 %v1038_v22  ;;  %v1422_v32 = vld [vmem:[%s1729_s28 + $0x58] sm:$0xf0]  ;;  %v1421_v33 = vor.u32 %v1542_v30, %v1420_v29  ;;  %v1036_v36 = vld [vmem:[%s2036_s5 + $0x8] sm:$0xff]  ;;  %v1942_v38 = vld [vmem:[%s2035_s4] ss:$0 sm:$0xff] }
  0xe4   : > { %v1425_v34 = vor.u32 %v1541_v31, %v1422_v32 }
  0xe6   : > { %989 = vmatpush.bf16.msra.mxu1 %v1559_v41  ;;  %941 = vmatpush.bf16.msra.mxu0 %v1550_v42 }
  0xe7   : > { %1570 = vmatpush.bf16.msra.mxu3 %v1550_v42 }
  0xea   : > { %990 = vmatpush.bf16.msra.mxu1 %v1558_v43  ;;  %942 = vmatpush.bf16.msra.mxu0 %v1549_v44 }
  0xeb   : > { %1571 = vmatpush.bf16.msra.mxu3 %v1549_v44 }
  0xee   : > { %991 = vmatpush.bf16.msra.mxu1 %v1557_v45  ;;  %943 = vmatpush.bf16.msra.mxu0 %v1548_v46 }
  0xef   : > { %1572 = vmatpush.bf16.msra.mxu3 %v1548_v46 }
  0xf2   : > { %992 = vmatpush.bf16.msra.mxu1 %v1556_v47  ;;  %944 = vmatpush.bf16.msra.mxu0 %v1547_v48 }
  0xf3   : > { %1573 = vmatpush.bf16.msra.mxu3 %v1547_v48 }
  0xf5   : > { %945 = vmatmul.bf16.vlgmr.msra.gmra.mxu0 %v1381_v56 }
  0xf6   : > { %993 = vmatpush.bf16.msra.mxu1 %v1555_v49  ;;  %975 = vmatmul.bf16.vlgmr.msra.gmra.mxu3 %v1429_v58 }
  0xf7   : > { %1574 = vmatpush.bf16.msrb.mxu3 %v1562_v35  ;;  %v1037_v35 = vld [vmem:[%s2036_s5 + $0x10] sm:$0xff] }
  0xf8   : > { %1101 = vmatpush.msra.mxu2 %v1037_v35 }
  0xf9   : > { %994 = vmatmul.bf16.vlgmr.msra.gmra.mxu1 %v1385_v57 }
  0xfa   : > { %1102 = vmatpush.msra.mxu2 %v1036_v36 }
  0xfb   : > { %1575 = vmatpush.bf16.msrb.mxu3 %v1561_v37  ;;  %v1035_v37 = vld [vmem:[%s2036_s5] sm:$0xff] }
  0xfc   : > { %1103 = vmatpush.msra.mxu2 %v1035_v37 }
  0xff   : > { %1576 = vmatpush.bf16.msrb.mxu3 %v1560_v39 }
 0x103   : > { %1577 = vmatpush.bf16.msrb.mxu3 %v1559_v41 }
 0x105   : > { %950 = vmatmul.bf16.gmra.mxu0 %v1389_v1 }
 0x106   : > { %980 = vmatmul.bf16.gmra.mxu3 %v1437_v3 }
 0x107   : > { %1578 = vmatpush.bf16.msrb.mxu3 %v1558_v43 }
 0x109   : > { %999 = vmatmul.bf16.gmra.mxu1 %v1393_v2 }
 0x10b   : > { %1579 = vmatpush.bf16.msrb.mxu3 %v1557_v45 }
 0x10f   : > { %1580 = vmatpush.bf16.msrb.mxu3 %v1556_v47 }
 0x113   : > { %1581 = vmatpush.bf16.msrb.mxu3 %v1555_v49 }
 0x115   : > { %955 = vmatmul.bf16.gmra.mxu0 %v1397_v10 }
 0x116   : > { %1024 = vmatmul.bf16.vlgmr.msrb.gmra.mxu3 %v1433_v12 }
 0x119   : > { %1004 = vmatmul.bf16.gmra.mxu1 %v1401_v11 }
 0x125   : > { %960 = vmatmul.bf16.gmra.mxu0 %v1405_v19 }
 0x126   : > { %1029 = vmatmul.bf16.gmra.mxu3 %v1441_v21 }
 0x129   : > { %1009 = vmatmul.bf16.gmra.mxu1 %v1409_v20 }
 0x135   : > { %965 = vmatmul.bf16.gmra.mxu0 %v1413_v27 }
 0x139   : > { %1014 = vmatmul.bf16.gmra.mxu1 %v1417_v28 }
 0x145   : > { %970 = vmatmul.bf16.gmra.mxu0 %v1421_v33 }
 0x149   : > { %1019 = vmatmul.bf16.gmra.mxu1 %v1425_v34 }
 0x172   : > { %v946_v39 = vpop.f32.mrf.mxu0 }
 0x173   : > { %v947_v41 = vadd.f32 %v1942_v38, %v946_v39 }
 0x176   : > { %v995_v40 = vpop.f32.mrf.mxu1 }
 0x177   : > { %v996_v42 = vadd.f32 %v995_v40, %v947_v41 }
 0x179   : > { %1506 = vmatmul.msk.f32.vlgmr.msra.gmra.mxu2 %vm1039_vm3, %v996_v42  ;;  %v976_v1 = vpop.f32.mrf.mxu3 }
 0x17a   : > { %v948_v43 = vpop.f32.mrf.mxu0  ;;  %v977_v28 = vadd.f32 %v1942_v38, %v976_v1 }
 0x17b   : > { %v949_v45 = vadd.f32 %v1942_v38, %v948_v43 }
 0x17e   : > { %v997_v44 = vpop.f32.mrf.mxu1 }
 0x17f   : > { %v998_v46 = vadd.f32 %v997_v44, %v949_v45 }
 0x181   : > { %1507 = vmatmul.msk.f32.gmra.mxu2 %vm1039_vm3, %v998_v46  ;;  %v978_v7 = vpop.f32.mrf.mxu3 }
 0x182   : > { %v951_v47 = vpop.f32.mrf.mxu0  ;;  %v979_v31 = vadd.f32 %v1942_v38, %v978_v7 }
 0x183   : > { %v952_v49 = vadd.f32 %v1942_v38, %v951_v47 }
 0x186   : > { %v1000_v48 = vpop.f32.mrf.mxu1 }
 0x187   : > { %v1001_v50 = vadd.f32 %v1000_v48, %v952_v49 }
 0x189   : > { %1508 = vmatmul.msk.f32.gmra.mxu2 %vm1039_vm3, %v1001_v50  ;;  %v981_v13 = vpop.f32.mrf.mxu3 }
 0x18a   : > { %v953_v51 = vpop.f32.mrf.mxu0  ;;  %v982_v34 = vadd.f32 %v1942_v38, %v981_v13 }
 0x18b   : > { %v954_v53 = vadd.f32 %v1942_v38, %v953_v51 }
 0x18e   : > { %v1002_v52 = vpop.f32.mrf.mxu1 }
 0x18f   : > { %v1003_v54 = vadd.f32 %v1002_v52, %v954_v53 }
 0x191   : > { %1509 = vmatmul.msk.f32.gmra.mxu2 %vm1039_vm3, %v1003_v54  ;;  %v983_v18 = vpop.f32.mrf.mxu3 }
 0x192   : > { %v956_v55 = vpop.f32.mrf.mxu0  ;;  %v984_v36 = vadd.f32 %v1942_v38, %v983_v18 }
 0x193   : > { %v957_v57 = vadd.f32 %v1942_v38, %v956_v55  ;;  %v1154_v55 = vld [vmem:[%s1724_s25] sm:$0x3] }
 0x196   : > { %v1005_v56 = vpop.f32.mrf.mxu1 }
 0x197   : > { %v1006_v58 = vadd.f32 %v1005_v56, %v957_v57  ;;  %v1153_v56 = vld [vmem:[#allocation3] sm:$0x3] }
 0x199   : > { %1510 = vmatmul.msk.f32.gmra.mxu2 %vm1039_vm3, %v1006_v58  ;;  %v1025_v25 = vpop.f32.mrf.mxu3 }
 0x19a   : > { %v958_v59 = vpop.f32.mrf.mxu0  ;;  %v1026_v29 = vadd.f32 %v1025_v25, %v977_v28 }
 0x19b   : > { %v959_v61 = vadd.f32 %v1942_v38, %v958_v59 }
 0x19e   : > { %v1007_v60 = vpop.f32.mrf.mxu1 }
 0x19f   : > { %v1008_v62 = vadd.f32 %v1007_v60, %v959_v61 }
 0x1a1   : > { %1511 = vmatmul.msk.f32.gmra.mxu2 %vm1039_vm3, %v1008_v62  ;;  %v1027_v30 = vpop.f32.mrf.mxu3 }
 0x1a2   : > { %v961_v63 = vpop.f32.mrf.mxu0  ;;  %v1028_v32 = vadd.f32 %v1027_v30, %v979_v31 }
 0x1a3   : > { %v962_v2 = vadd.f32 %v1942_v38, %v961_v63 }
 0x1a6   : > { %v1010_v0 = vpop.f32.mrf.mxu1 }
 0x1a7   : > { %v1011_v3 = vadd.f32 %v1010_v0, %v962_v2 }
 0x1a9   : > { %1512 = vmatmul.msk.f32.gmra.mxu2 %vm1039_vm3, %v1011_v3  ;;  %v1030_v33 = vpop.f32.mrf.mxu3 }
 0x1aa   : > { %v963_v4 = vpop.f32.mrf.mxu0  ;;  %v1031_v35 = vadd.f32 %v1030_v33, %v982_v34 }
 0x1ab   : > { %v964_v6 = vadd.f32 %v1942_v38, %v963_v4 }
 0x1ae   : > { %v1012_v5 = vpop.f32.mrf.mxu1 }
 0x1af   : > { %v1013_v8 = vadd.f32 %v1012_v5, %v964_v6 }
 0x1b1   : > { %1513 = vmatmul.msk.f32.gmra.mxu2 %vm1039_vm3, %v1013_v8  ;;  %v1032_v37 = vpop.f32.mrf.mxu3 }
 0x1b2   : > { %v966_v9 = vpop.f32.mrf.mxu0  ;;  %v1033_v39 = vadd.f32 %v1032_v37, %v984_v36 }
 0x1b3   : > { %v967_v11 = vadd.f32 %v1942_v38, %v966_v9 }
 0x1b6   : > { %v1015_v10 = vpop.f32.mrf.mxu1 }
 0x1b7   : > { %v1016_v12 = vadd.f32 %v1015_v10, %v967_v11 }
 0x1b9   : > { %1514 = vmatmul.msk.f32.gmra.mxu2 %vm1039_vm3, %v1016_v12 }
 0x1ba   : > { %v968_v14 = vpop.f32.mrf.mxu0 }
 0x1bb   : > { %v969_v16 = vadd.f32 %v1942_v38, %v968_v14 }
 0x1be   : > { %v1017_v15 = vpop.f32.mrf.mxu1 }
 0x1bf   : > { %v1018_v17 = vadd.f32 %v1017_v15, %v969_v16 }
 0x1c1   : > { %1515 = vmatmul.msk.f32.gmra.mxu2 %vm1039_vm3, %v1018_v17 }
 0x1c2   : > { %v971_v19 = vpop.f32.mrf.mxu0 }
 0x1c3   : > { %v972_v21 = vadd.f32 %v1942_v38, %v971_v19 }
 0x1c6   : > { %v1020_v20 = vpop.f32.mrf.mxu1 }
 0x1c7   : > { %v1021_v22 = vadd.f32 %v1020_v20, %v972_v21 }
 0x1c9   : > { %1516 = vmatmul.msk.f32.gmra.mxu2 %vm1039_vm3, %v1021_v22 }
 0x1ca   : > { %v973_v23 = vpop.f32.mrf.mxu0 }
 0x1cb   : > { %v974_v24 = vadd.f32 %v1942_v38, %v973_v23 }
 0x1ce   : > { %v1022_v26 = vpop.f32.mrf.mxu1 }
 0x1cf   : > { %v1023_v27 = vadd.f32 %v1022_v26, %v974_v24 }
 0x1d1   : > { %1517 = vmatmul.msk.f32.gmra.mxu2 %vm1039_vm3, %v1023_v27 }
 0x1d9   : > { %1518 = vmatmul.msk.f32.gmra.mxu2 %vm1039_vm3, %v1026_v29 }
 0x1e1   : > { %1519 = vmatmul.msk.f32.gmra.mxu2 %vm1039_vm3, %v1028_v32 }
 0x1e9   : > { %1520 = vmatmul.msk.f32.gmra.mxu2 %vm1039_vm3, %v1031_v35 }
 0x1f1   : > { %1521 = vmatmul.msk.f32.gmra.mxu2 %vm1039_vm3, %v1033_v39 }
 0x1fc   : > { %v1105_v40 = vpop.f32.mrf.mxu2 }
 0x204   : > { %v1108_v41 = vpop.f32.mrf.mxu2 }
 0x20c   : > { %v1111_v42 = vpop.f32.mrf.mxu2 }
 0x214   : > { %v1114_v43 = vpop.f32.mrf.mxu2 }
 0x21c   : > { %v1117_v44 = vpop.f32.mrf.mxu2 }
 0x224   : > { %v1120_v45 = vpop.f32.mrf.mxu2 }
 0x22c   : > { %v1123_v46 = vpop.f32.mrf.mxu2 }
 0x234   : > { %v1126_v47 = vpop.f32.mrf.mxu2 }
 0x23c   : > { %v1129_v48 = vpop.f32.mrf.mxu2 }
 0x244   : > { %v1132_v49 = vpop.f32.mrf.mxu2 }
 0x24c   : > { %v1135_v50 = vpop.f32.mrf.mxu2 }
 0x254   : > { %v1138_v51 = vpop.f32.mrf.mxu2 }
 0x25c   : > { %v1141_v52 = vpop.f32.mrf.mxu2 }
 0x264   : > { %v1144_v53 = vpop.f32.mrf.mxu2 }
 0x26c   : > { %v1147_v54 = vpop.f32.mrf.mxu2 }
 0x274   : > { %v1150_v38 = vpop.f32.mrf.mxu2 }
 0x275   : > { %1155 = vmatpush.msra.mxu3 %v1150_v38 }
 0x277   : > { %1156 = vmatpush.msra.mxu3 %v1147_v54 }
 0x279   : > { %1157 = vmatpush.msra.mxu3 %v1144_v53 }
 0x27b   : > { %1158 = vmatpush.msra.mxu3 %v1141_v52 }
 0x27d   : > { %1159 = vmatpush.msra.mxu3 %v1138_v51 }
 0x27f   : > { %1160 = vmatpush.msra.mxu3 %v1135_v50 }
 0x281   : > { %1161 = vmatpush.msra.mxu3 %v1132_v49 }
 0x283   : > { %1162 = vmatpush.msra.mxu3 %v1129_v48 }
 0x285   : > { %1163 = vmatpush.msra.mxu3 %v1126_v47 }
 0x287   : > { %1164 = vmatpush.msra.mxu3 %v1123_v46 }
 0x289   : > { %1165 = vmatpush.msra.mxu3 %v1120_v45 }
 0x28b   : > { %1166 = vmatpush.msra.mxu3 %v1117_v44 }
 0x28d   : > { %1167 = vmatpush.msra.mxu3 %v1114_v43 }
 0x28f   : > { %1168 = vmatpush.msra.mxu3 %v1111_v42 }
 0x291   : > { %1169 = vmatpush.msra.mxu3 %v1108_v41 }
 0x293   : > { %1170 = vmatpush.msra.mxu3 %v1105_v40 }
 0x294   : > { %1171 = vmatmul.f32.vlgmr.msra.gmra.mxu3 %v1154_v55 }
 0x316   : > { %1181 = sbr.rel (%p1522_p6) target bundleno = 1098 (0x44a), region = 72 }
 0x317   : > { %v1172_v57 = vpop.f32.mrf.mxu3 }
 0x318   : > { %v1175_v58 = vadd.f32 %v1172_v57, %v1153_v56 }
 0x31a   : > { %1177 = vst.msk [vmem:[#allocation3] sm:$0x3] %vm1176_vm4, %v1175_v58 }
 0x31b   : > { %v1195_v59 = vld [vmem:[%s2038_s7 + $0x38] sm:$0xff]  ;;  %v1194_v60 = vld [vmem:[%s2038_s7 + $0x30] sm:$0xff]  ;;  %v1193_v61 = vld [vmem:[%s2038_s7 + $0x28] sm:$0xff]  ;;  %vm1200_vm5 = vcmask 523264   ;;  %vm1275_vm9 = vcmask 25600  }
 0x31c   : > { %1212 = vmatpush.msra.mxu0 %v1195_v59  ;;  %v1228_v62 = vld [vmem:[%s2040_s9 + $0x18] sm:$0xff]  ;;  %v1192_v63 = vld [vmem:[%s2038_s7 + $0x20] sm:$0xff]  ;;  %v1190_v1 = vld [vmem:[%s2038_s7 + $0x10] sm:$0xff] }
 0x31d   : > { %1248 = vmatpush.msra.mxu1 %v1228_v62  ;;  %v1191_v0 = vld [vmem:[%s2038_s7 + $0x18] sm:$0xff]  ;;  %v1599_v2 = vld [vmem:[%s2037_s6] ss:$0 sm:$0xff]  ;;  %v1189_v4 = vld [vmem:[%s2038_s7 + $0x8] sm:$0xff] }
 0x31e   : > { %1213 = vmatpush.msra.mxu0 %v1194_v60  ;;  %v1188_v5 = vld [vmem:[%s2038_s7] sm:$0xff]  ;;  %v1227_v7 = vld [vmem:[%s2040_s9 + $0x10] sm:$0xff]  ;;  %v1226_v8 = vld [vmem:[%s2040_s9 + $0x8] sm:$0xff] }
 0x31f   : > { %1249 = vmatpush.msra.mxu1 %v1227_v7  ;;  %v1225_v9 = vld [vmem:[%s2040_s9] sm:$0xff] }
 0x320   : > { %1214 = vmatpush.msra.mxu0 %v1193_v61  ;;  %v1600_v10 = vld [vmem:[%s2039_s8] ss:$0 sm:$0xff] }
 0x321   : > { %v1182_v3 = vld [vmem:[#allocation3] sm:$0x3]  ;;  %1250 = vmatpush.msra.mxu1 %v1226_v8 }
 0x322   : > { %1215 = vmatpush.msra.mxu0 %v1192_v63  ;;  %v1187_v6 = vadd.f32 %v1599_v2, %v1182_v3  ;;  %v1601_v14 = vld [vmem:[%s2041_s10] ss:$0 sm:$0xff] }
 0x323   : > { %1251 = vmatpush.msra.mxu1 %v1225_v9 }
 0x324   : > { %1216 = vmatpush.msra.mxu0 %v1191_v0 }
 0x326   : > { %1217 = vmatpush.msra.mxu0 %v1190_v1 }
 0x328   : > { %1218 = vmatpush.msra.mxu0 %v1189_v4 }
 0x32a   : > { %1219 = vmatpush.msra.mxu0 %v1188_v5 }
 0x32b   : > { %1523 = vmatmul.msk.f32.vlgmr.msra.gmra.mxu0 %vm1200_vm5, %v1187_v6 }
 0x3a8   : > { %v1221_v11 = vpop.f32.mrf.mxu0 }
 0x3a9   : > { %v1222_v12 = vadd.f32 %v1600_v10, %v1221_v11 }
 0x3ab   : > { %v1224_v13 = vmax.f32 %v1222_v12, 0.0 }
 0x3ad   : > { %1524 = vmatmul.msk.f32.vlgmr.msra.gmra.mxu1 %vm1039_vm3, %v1224_v13 }
 0x42a   : > { %v1253_v15 = vpop.f32.mrf.mxu1 }
 0x42b   : > { %v1254_v16 = vadd.f32 %v1601_v14, %v1253_v15 }
 0x42d   : > { %v1525_v17 = vmul.f32 -1.442695, %v1254_v16 }
 0x42f   : > { %1602 = vpow2.f32 %v1525_v17 }
 0x435   : > { %v1603_v18 = vpop.eup %1602 }
 0x436   : > { %v1259_v19 = vadd.f32 1.0, %v1603_v18 }
 0x438   : > { %1604 = vrcp.f32 %v1259_v19  ;;  %v1271_v23 = vand.u32 2147483648, %v1259_v19  ;;  %v1269_v25 = vand.u32 2147483647, %v1259_v19  ;;  %vm1265_vm7 = vweird.f32 %v1259_v19 }
 0x43a   : > { %v1272_v27 = vor.u32 1.1754944e-38, %v1271_v23  ;;  %vm1270_vm10 = vcmp.eq.f32.partialorder %v1269_v25, 8.507059e+37 }
 0x43e   : > { %v1605_v20 = vpop.eup %1604 }
 0x43f   : > { %v1261_v21 = vmul.f32 %v1605_v20, %v1259_v19  ;;  %vm1266_vm6 = vweird.f32 %v1605_v20 }
 0x440   : > { %vm1267_vm8 = vmor %vm1265_vm7, %vm1266_vm6 }
 0x441   : > { %v1262_v22 = vsub.f32 1.0, %v1261_v21 }
 0x443   : > { %v1263_v24 = vmul.f32 %v1605_v20, %v1262_v22 }
 0x445   : > { %v1264_v26 = vadd.f32 %v1605_v20, %v1263_v24 }
 0x447   : > { %v1268_v28 = vsel %vm1267_vm8, %v1605_v20, %v1264_v26 }
 0x448   : > { %v1273_v29 = vsel %vm1270_vm10, %v1272_v27, %v1268_v28 }
 0x449   : > { %1276 = vst.msk [vmem:[#allocation4] sm:$0x3] %vm1275_vm9, %v1273_v29 }
 0x44a PF: > { %p1586_p7 = scmp.eq.s32.totalorder %s1714_s18, 1  ;;  %s1647_s24 = smov [#allocation4]  }
 0x44b   : > { %s1283_s26 = sshll.u32 %s1647_s24, 4  ;;  %s1285_s29 = sshll.u32 %s2042_s11, 4  ;;  %s1284_s26 = int_to_ptr.vmem [resolvable:$true] %s1283_s26  ;;  %s1286_s29 = int_to_ptr.hbm [resolvable:$true] %s1285_s29 }
 0x44c   : > { %1583 = dma.vmem_to_hbm [thread:$0]  (%p1586_p7), %s1284_s26, 32, %s1286_s29, [#allocation5]  }
 0x44d   : > { %1639 = dma.done.wait (%p1586_p7), [#allocation5], 32  }
 0x44e   : > { %1641 = vsyncadd (%p1586_p7), [#allocation5], 4294967264 }
 0x44f PF: > { %s22_s17 = sadd.s32 1, %s1644_s17  }
 0x450   : > { %p19_p8 = scmp.ge.s32.totalorder %s22_s17, 4  }
 0x452   :  { %21 = sbr.rel (!%p19_p8) target bundleno = 1 (0x1), region = 102 }
 0x457   :  { %1299 = vsyncpa [#allocation5], 1 }
 0x458   :  { %1301 = vsyncpa [#allocation5 + $0x1], 1 }

</bundles_post_ra>
